<compile_context>
chip_gen: v5e
topology: v5e:2x2
jax: 0.10.0
libtpu: 0.0.40
codegen_flags: <defaults>
</compile_context>

<pallas_src>
import jax
import jax.numpy as jnp
from jax.experimental import pallas as pl
from jax.experimental.pallas import tpu as pltpu


def _make_kernel(N, use_mxu):
    six_n = 6.0 * float(N)
    if use_mxu:
        def kernel(x_ref, o_ref):
            # Row-sum broadcast via a single MXU tile: (tb,N) @ ones(N,N).
            ones = jnp.ones((N, N), dtype=x_ref.dtype)
            acc = jnp.dot(x_ref[...], ones, preferred_element_type=jnp.float32)
            o_ref[...] = (3.0 * acc + six_n).astype(o_ref.dtype)
    else:
        def kernel(x_ref, o_ref):
            # XLU lane-reduce in f32 (no explicit full-tile astype copy).
            s = jnp.sum(x_ref[...], axis=-1, keepdims=True, dtype=jnp.float32)
            row = 3.0 * s + six_n
            o_ref[...] = jnp.broadcast_to(row, o_ref.shape).astype(o_ref.dtype)
    return kernel


def ptmodule_forward(x, *, tb=None, vmem_budget_bytes=None):
    """y = (x + 2) * 3 with each row replaced by its own row-sum (broadcast back)."""
    B, N = x.shape
    itemsize = jnp.dtype(x.dtype).itemsize
    # Dtype-aware sublane packing: f32 -> 8, bf16 -> 16, int8/fp8 -> 32 rows.
    align = {4: 8, 2: 16, 1: 32}.get(itemsize, 8)

    if tb is None:
        if vmem_budget_bytes is None:
            # Generation-aware budget for the live pipeline footprint.
            # v5e/v6e (128 MiB physical) -> 24 MiB; v7x (64 MiB per TC) -> 16 MiB.
            vmem_budget_bytes = 16 << 20
            try:
                phys = getattr(pltpu.get_tpu_info(), "vmem_capacity_bytes", None)
                if phys:
                    vmem_budget_bytes = int(min(24 << 20, max(8 << 20, phys // 4)))
            except Exception:
                pass
        # 2x input + 2x output double-buffered blocks (native dtype) + one f32 temp row.
        per_row_bytes = N * (4 * itemsize + 4)
        max_rows = max(align, vmem_budget_bytes // per_row_bytes)
        tb = int(min(8192, (max_rows // align) * align))

    # Guarantee several grid steps when B allows: megacore sharding on v7x
    # ("parallel" only helps with >= 2 steps) and pipeline overlap everywhere.
    if B > 2 * align:
        tb_par = (((B + 3) // 4) + align - 1) // align * align   # ~cdiv(B,4), align-rounded
        tb = min(tb, tb_par)

    # Never bigger than the (align-rounded-down) batch; the last partial block
    # is handled by Pallas (padded reads, masked writes) - no wrapper pad/slice.
    tb = int(max(align, min(tb, max(align, (B // align) * align))))

    grid = (pl.cdiv(B, tb),)

    # MXU path only when the contraction is a clean MXU tile.
    use_mxu = (N % 128 == 0) and (N <= 256)
    # TODO(synk): if N is ever < 128 or not a multiple of 128, present a
    # lane-dense output slab instead of inheriting N in out_specs (masked
    # vst.msk partial stores are the biggest store-side overhead).

    block_bytes = tb * N * itemsize
    footprint = 4 * block_bytes + tb * N * 4 + (N * N * itemsize if use_mxu else 0) + (2 << 20)
    vmem_limit = int(min(32 << 20, max(8 << 20, footprint)))

    cost = pl.CostEstimate(
        flops=3 * B * N,
        transcendentals=0,
        bytes_accessed=2 * B * N * itemsize,
    )

    return pl.pallas_call(
        _make_kernel(N, use_mxu),
        out_shape=jax.ShapeDtypeStruct((B, N), x.dtype),
        grid=grid,
        in_specs=[pl.BlockSpec((tb, N), lambda i: (i, 0))],
        out_specs=pl.BlockSpec((tb, N), lambda i: (i, 0)),
        compiler_params=pltpu.CompilerParams(
            dimension_semantics=("parallel",),
            vmem_limit_bytes=vmem_limit,
        ),
        cost_estimate=cost,
    )(x)


if __name__ == "__main__":
    key = jax.random.PRNGKey(0)
    # Small shape; B=20 intentionally not a multiple of 8 so the last grid block
    # is partial (exercises the no-pad ragged path; grid = cdiv(20, 8) = 3).
    B, N = 20, 128
    x = jax.random.normal(key, (B, N), dtype=jnp.float32)

    out = jax.block_until_ready(ptmodule_forward(x))

    # Reference check (plain JAX, element-wise path like the PyTorch module).
    y_ref = (x + 2.0) * 3.0
    ref = jnp.broadcast_to(jnp.sum(y_ref, axis=-1, keepdims=True), (B, N))
    assert out.shape == (B, N)
    assert jnp.allclose(out, ref, rtol=1e-5, atol=1e-3), "mismatch vs reference"

    print("KERNEL_OK")
</pallas_src>

<mosaic_0001>
module attributes {stable_mosaic.version = 11 : i64} {
  func.func @kernel(%arg0: i32, %arg1: memref<8x128xf32, #tpu.memory_space<vmem>>, %arg2: memref<8x128xf32, #tpu.memory_space<vmem>>) attributes {dimension_semantics = [#tpu.dimension_semantics<parallel>], iteration_bounds = array<i64: 3>, scalar_prefetch = 0 : i64, scratch_operands = 0 : i64, tpu.core_type = #tpu.core_type<tc>, window_params = [{transform_indices = @transform_0, window_bounds = array<i64: 8, 128>}, {transform_indices = @transform_1, window_bounds = array<i64: 8, 128>}]} {
    %cst = arith.constant 1.000000e+00 : f32
    %0 = vector.broadcast %cst : f32 to vector<128x128xf32>
    %c0 = arith.constant 0 : index
    %c0_0 = arith.constant 0 : index
    %1 = vector.load %arg1[%c0, %c0_0] : memref<8x128xf32, #tpu.memory_space<vmem>>, vector<8x128xf32>
    %cst_1 = arith.constant dense<0.000000e+00> : vector<8x128xf32>
    %2 = tpu.matmul %1, %0, %cst_1 {dimension_numbers = #tpu.dot_dimension_numbers<[1], [0], [0], [1], [0, 0, 1, 1], [], []>} : vector<8x128xf32>, vector<128x128xf32>, vector<8x128xf32> -> vector<8x128xf32>
    %cst_2 = arith.constant 3.000000e+00 : f32
    %3 = vector.broadcast %cst_2 : f32 to vector<8x128xf32>
    %4 = arith.mulf %3, %2 : vector<8x128xf32>
    %cst_3 = arith.constant 7.680000e+02 : f32
    %5 = vector.broadcast %cst_3 : f32 to vector<8x128xf32>
    %6 = arith.addf %4, %5 : vector<8x128xf32>
    %c0_4 = arith.constant 0 : index
    %c0_5 = arith.constant 0 : index
    %7 = vector.load %arg2[%c0_4, %c0_5] : memref<8x128xf32, #tpu.memory_space<vmem>>, vector<8x128xf32>
    tpu.vector_store %arg2[%c0_4, %c0_5], %6 {strides = array<i32>} : memref<8x128xf32, #tpu.memory_space<vmem>>, vector<8x128xf32>,
    return
  }
  func.func @transform_0(%arg0: i32) -> (i32, i32) {
    %c0_i32 = arith.constant 0 : i32
    %c0_i32_0 = arith.constant 0 : i32
    return %arg0, %c0_i32 : i32, i32
  }
  func.func @transform_1(%arg0: i32) -> (i32, i32) {
    %c0_i32 = arith.constant 0 : i32
    %c0_i32_0 = arith.constant 0 : i32
    return %arg0, %c0_i32 : i32, i32
  }
}

</mosaic_0001>

<bundles_post_ra>
// kernel: tpu_custom_call.1
= control target key start
LH: loop header
LB: loop body
LE: loop exit
PB: predicated region body
PF: predicated region fallthrough
CT: control target
= control target key end

     0   :  { %6 = vsyncpa [#allocation3], 0  ;;  %s537_s0 = inlined_call_operand.hbm [shape: f32[20,128], index: 0, kind: input, shape index: {}]   ;;  %s538_s1 = inlined_call_operand.hbm [shape: f32[20,128], index: 1, kind: output, shape index: {}]  }
   0x1   :  { %8 = vsyncpa [#allocation3 + $0x1], 0 }
   0x2   :  { %9 = vsyncpa [#allocation4], 0 }
   0x3   :  { %11 = vsyncpa [#allocation4 + $0x1], 0  ;;  %s412_s6 = smov 0   ;;  %s414_s7 = smov 0  }
   0x4   :  { %s416_s8 = smov 0   ;;  %s418_s9 = smov 0  }
   0x5 LB: > { %s433_s10 = sadd.s32 4294967295, %s399_s9   ;;  %s244_s11 = sadd.s32 4294967294, %s399_s9   ;;  %s399_s9 = sphi %s418_s9, %s547_s9   ;;  %s395_s8 = sphi %s416_s8, %s546_s8   ;;  %s391_s7 = sphi %s414_s7, %s545_s7   ;;  %s387_s6 = sphi %s412_s6, %s544_s6  }
   0x6   : > { %s437_s12 = sadd.s32 1, %s399_s9   ;;  %s24_s13 = sadd.s32 1, %s395_s8 }
   0x7   : > { %s21_s14 = ssub.s32 %s399_s9, %s437_s12  ;;  %p31_p0 = scmp.ne.s32.totalorder %s395_s8, %s391_s7 }
   0x8   : > { %p22_p1 = scmp.eq.s32.totalorder %s21_s14, 0  ;;  %p32_p2 = scmp.eq.s32.totalorder %s399_s9, 0 }
   0x9   : > { %p37_p3 = scmp.ne.s32.totalorder %s391_s7, %s387_s6  ;;  %p38_p4 = scmp.eq.s32.totalorder %s433_s10, 0 }
   0xa   : > { %s449_s15 = scalar_select %p22_p1, %s395_s8, %s24_s13  }
   0xb   : > { %p451_p5 = por %p32_p2, %p31_p0  ;;  %p455_p6 = por %p38_p4, %p37_p3 }
   0xc   : > { %p61_p7 = scmp.eq.s32.totalorder %s433_s10, 2  ;;  %p67_p8 = scmp.eq.s32.totalorder %s244_s11, 2 }
   0xd   : > { %p268_p9 = scmp.lt.s32.totalorder %s399_s9, 3  ;;  %s87_s20 = sand.u32 1, %s395_s8  }
   0xe   : > { %p461_p10 = por %p61_p7, %p31_p0  ;;  %p465_p11 = por %p67_p8, %p37_p3 }
   0xf   : > { %s248_s21 = sshll.u32 %s399_s9, 3  ;;  %s247_s22 = sshll.u32 %s87_s20, 3 }
  0x10   : > { %s95_s25 = scalar_lea.hbm %s537_s0, %s248_s21  ;;  %s91_s27 = scalar_lea.vmem [#allocation2], %s247_s22 }
  0x11   : > { %s97_s26 = sshll.u32 %s95_s25, 4  ;;  %s99_s28 = sshll.u32 %s91_s27, 4  ;;  %s98_s26 = int_to_ptr.hbm [resolvable:$true] %s97_s26  ;;  %s100_s28 = int_to_ptr.vmem [resolvable:$true] %s99_s28 }
  0x12   : > { %p476_p12 = pnand %p268_p9, %p451_p5  ;;  %p249_p13 = scmp.ge.s32.totalorder %s399_s9, 1 }
  0x13   : > { %p104_p0 = scmp.lt.s32.totalorder %s399_s9, 4  ;;  %s88_s30 = scalar_lea.sflag [#allocation3], %s87_s20 }
  0x14   : > { %s303_s2 = sshra.s32 %s98_s26, 4  ;;  %p307_p2 = pneg %p476_p12  ;;  %s304_s2 = int_to_ptr.hbm [resolvable:$true] %s303_s2 }
  0x15   : > { %s305_s3 = scalar_lea.hbm %s304_s2, 8  ;;  %s310_s11 = scalar_lea.hbm %s537_s0, 24 }
  0x16   : > { %p306_p1 = scmp.ne.s32.totalorder %s304_s2, %s305_s3  ;;  %p311_p5 = scmp.lt.s32.totalorder %s304_s2, %s537_s0 }
  0x17   : > { %p312_p7 = scmp.lt.s32.totalorder %s310_s11, %s305_s3 }
  0x18   : > { %p308_p3 = pnand %p307_p2, %p306_p1 }
  0x19   : > { %p313_p8 = por %p312_p7, %p311_p5 }
  0x1a   : > { %p309_p4 = pneg %p308_p3 }
  0x1c   : > { %p314_p9 = pnand %p313_p8, %p309_p4 }
  0x1e   : > { %317 = shalt.err (!%p314_p9)
}
  0x1f   : > { %263 = dma.hbm_to_vmem [thread:$0]  (!%p476_p12), %s98_s26, 128, %s100_s28, %s88_s30  }
  0x20   : > { %p105_p1 = pnand %p249_p13, %p104_p0 }
  0x21   : > { %s497_s16 = sand.u32 (!%p105_p1), 1, %s391_s7  }
  0x22   : > { %108 = sbr.rel (%p105_p1) target bundleno = 205 (0xcd), region = 24  ;;  %s250_s20 = sshll.u32 (!%p105_p1), %s497_s16, 3 }
  0x23   : > { %s111_s21 = scalar_lea.sflag (!%p105_p1), [#allocation3], %s497_s16  ;;  %s114_s22 = scalar_lea.vmem (!%p105_p1), [#allocation2], %s250_s20 }
  0x27   : > { %378 = dma.done.wait (%p455_p6), %s111_s21, 128  }
  0x28   : > { %380 = vsyncadd (%p455_p6), %s111_s21, 4294967168  ;;  %v401_v0 = vmov 1.0   ;;  %v134_v1 = vld [vmem:[%s114_s22] sm:$0xff]  ;;  %s253_s17 = sshll.u32 %s433_s10, 3  ;;  %s133_s26 = scalar_lea.vmem [#allocation5], %s250_s20 }
  0x29   : > { %135 = vmatpush.msra.mxu0 %v401_v0  ;;  %s169_s25 = scalar_lea.hbm %s538_s1, %s253_s17  ;;  %s171_s27 = sshll.u32 %s133_s26, 4  ;;  %s172_s27 = int_to_ptr.vmem [resolvable:$true] %s171_s27 }
  0x2a   : > { %s173_s28 = sshll.u32 %s169_s25, 4  ;;  %s159_s29 = scalar_lea.sflag [#allocation4], %s497_s16  ;;  %s174_s28 = int_to_ptr.hbm [resolvable:$true] %s173_s28 }
  0x2b   : > { %136 = vmatpush.msra.mxu0 %v401_v0  ;;  %s347_s30 = sshra.s32 %s174_s28, 4  ;;  %s353_s4 = scalar_lea.hbm %s538_s1, 24  ;;  %s348_s30 = int_to_ptr.hbm [resolvable:$true] %s347_s30 }
  0x2c   : > { %s349_s2 = scalar_lea.hbm %s348_s30, 8  ;;  %p354_p0 = scmp.lt.s32.totalorder %s348_s30, %s538_s1 }
  0x2d   : > { %137 = vmatpush.msra.mxu0 %v401_v0  ;;  %p350_p6 = scmp.ne.s32.totalorder %s348_s30, %s349_s2  ;;  %p355_p2 = scmp.lt.s32.totalorder %s353_s4, %s349_s2 }
  0x2f   : > { %138 = vmatpush.msra.mxu0 %v401_v0  ;;  %p351_p12 = pnand %p350_p6, %p461_p10  ;;  %p356_p3 = por %p355_p2, %p354_p0 }
  0x31   : > { %139 = vmatpush.msra.mxu0 %v401_v0  ;;  %p352_p13 = pneg %p351_p12 }
  0x33   : > { %140 = vmatpush.msra.mxu0 %v401_v0  ;;  %p357_p4 = pnand %p356_p3, %p352_p13 }
  0x35   : > { %141 = vmatpush.msra.mxu0 %v401_v0 }
  0x37   : > { %142 = vmatpush.msra.mxu0 %v401_v0 }
  0x39   : > { %143 = vmatpush.msra.mxu0 %v401_v0 }
  0x3b   : > { %144 = vmatpush.msra.mxu0 %v401_v0 }
  0x3d   : > { %145 = vmatpush.msra.mxu0 %v401_v0 }
  0x3f   : > { %146 = vmatpush.msra.mxu0 %v401_v0 }
  0x41   : > { %147 = vmatpush.msra.mxu0 %v401_v0 }
  0x43   : > { %148 = vmatpush.msra.mxu0 %v401_v0 }
  0x45   : > { %149 = vmatpush.msra.mxu0 %v401_v0 }
  0x47   : > { %150 = vmatpush.msra.mxu0 %v401_v0 }
  0x48   : > { %151 = vmatmul.f32.vlgmr.msra.gmra.mxu0 %v134_v1 }
  0xc5   : > { %v152_v2 = vpop.f32.mrf.mxu0 }
  0xc6   : > { %v155_v3 = vmul.f32 3.0, %v152_v2 }
  0xc8   : > { %v156_v4 = vadd.f32 768.0, %v155_v3 }
  0xca   : > { %157 = vst [vmem:[%s133_s26] sm:$0xff] %v156_v4 }
  0xcb   : > { %360 = shalt.err (!%p357_p4)
}
  0xcc   : > { %258 = dma.vmem_to_hbm [thread:$0]  (%p461_p10), %s172_s27, 128, %s174_s28, %s159_s29  }
  0xcd PF: > { %p269_p5 = scmp.ge.s32.totalorder %s399_s9, 2  ;;  %s185_s13 = sand.u32 1, %s387_s6  }
  0xce   : > { %s186_s14 = scalar_lea.sflag [#allocation4], %s185_s13 }
  0xcf   : > { %p265_p7 = pnand %p269_p5, %p465_p11 }
  0xd1   : > { %p266_p8 = pneg %p265_p7 }
  0xd3   : > { %382 = dma.done.wait (%p266_p8), %s186_s14, 128  }
  0xd4   : > { %384 = vsyncadd (%p266_p8), %s186_s14, 4294967168  ;;  %p14_p9 = scmp.ge.s32.totalorder %s437_s12, 5   ;;  %s544_s6 = smov %s391_s7 }
  0xd5   : > { %s545_s7 = smov %s395_s8  ;;  %s546_s8 = smov %s449_s15 }
  0xd6   : > { %s547_s9 = smov %s437_s12  ;;  %16 = sbr.rel (!%p14_p9) target bundleno = 5 (0x5), region = 69 }
  0xdb   :  { %192 = vsyncpa [#allocation3], 1 }
  0xdc   :  { %194 = vsyncpa [#allocation3 + $0x1], 1 }
  0xdd   :  { %195 = vsyncpa [#allocation4], 1 }
  0xde   :  { %197 = vsyncpa [#allocation4 + $0x1], 1 }

</bundles_post_ra>
